<compile_context>
chip_gen: v6e
topology: v6e:2x2x1
jax: 0.10.0
libtpu: 0.0.40
codegen_flags: <defaults>
</compile_context>

<pallas_src>
import functools
import math

import numpy as np
import jax
import jax.numpy as jnp
from jax import lax
from jax.experimental import pallas as pl
from jax.experimental.pallas import tpu as pltpu


def _convt_kernel(x_ref, w_ref, b_ref, o_ref, *, k_h, d_h, w_out, tm):
    # x_ref: (1, 1, kW*Cin, slab_len)  row-slab of the shifted/flattened input
    # w_ref: (Cout, K)                 flipped conv-transpose weights, K = kH*kW*Cin
    # b_ref: (Cout, 1)                 bias, f32
    # o_ref: (1, Cout, tm)             lane-dense output tile (tm = rows_per_tile*w_out)
    xs = x_ref[0, 0]                                   # (kW*Cin, slab_len)
    parts = []
    for kh in range(k_h):                              # static unrolled, static slices
        start = kh * d_h * w_out
        parts.append(xs[:, start:start + tm])          # (kW*Cin, tm)
    patches = parts[0] if k_h == 1 else jnp.concatenate(parts, axis=0)   # (K, tm)
    # Single deep-contraction MXU matmul, f32 accumulation.
    acc = jnp.dot(w_ref[...], patches, preferred_element_type=jnp.float32)
    acc = acc + b_ref[...]                             # f32 bias add (safe on v5e)
    # NOTE(v5e): if out dtype is bf16 the Cout(=8)-row tile is half of the native
    # 16-sublane bf16 tile -> masked stores; acceptable (lane dim stays >=128).
    o_ref[0, :, :] = acc.astype(o_ref.dtype)


def _pick_row_tile(h_out, w_out, n_batch, k_h, k_w, cin, cout, d_h,
                   comp_isz, out_isz, vmem_budget):
    """Pick rows-per-tile `th` (a divisor of h_out).

    Constraints / preferences:
      * th*w_out % 128 == 0 (unmasked, lane-dense blocks) or fall back to th=h_out
        (full-sample block, always a legal BlockSpec).
      * per-step VMEM (double-buffered in/out blocks + patches + f32 acc + weights)
        fits the budget (v7x has only 64 MiB physical VMEM).
      * >= 8 total grid steps when possible (>= 4 per v7x TensorCore, and enough
        steps for input-prefetch / output-writeback overlap on v5e/v6e).
      * tile width <= 8192 lanes (near the measured HBM-roofline sweet spot).
    """
    k_dim = k_h * k_w * cin
    kwcin = k_w * cin
    halo = d_h * (k_h - 1) * w_out

    def need(th):
        tm = th * w_out
        in_blk = kwcin * (tm + halo) * comp_isz
        out_blk = cout * tm * out_isz
        patches = k_dim * tm * comp_isz
        acc = cout * tm * 4
        wmat = cout * k_dim * comp_isz + cout * 4
        return 2 * (in_blk + out_blk) + patches + acc + wmat + (1 << 20)

    cands = [t for t in range(1, h_out + 1)
             if h_out % t == 0 and (t * w_out) % 128 == 0]
    if not cands:
        th = h_out                      # full-sample tile (see TODO above)
        return th, need(th)
    fit = [t for t in cands if need(t) <= vmem_budget] or [min(cands)]
    small = [t for t in fit if t * w_out <= 8192] or fit
    many = [t for t in small if n_batch * (h_out // t) >= 8] or small
    th = max(many, key=lambda t: t * w_out)
    return th, need(th)


def meta_conv_transpose2d(x_nchw, weight, bias=None, *, stride=(1, 1),
                          padding=(0, 0), output_padding=(0, 0),
                          dilation=(1, 1), groups=1, compute_dtype=None):
    """Matches torch.nn.functional.conv_transpose2d (groups=1).

    x_nchw: (N, Cin, H, W); weight: (Cin, Cout, kH, kW); bias: (Cout,) or None.
    compute_dtype: MXU operand dtype; defaults to bfloat16 for float32 inputs.
    Accumulation and bias add are always f32; output dtype == input dtype.
    """
    n, cin, h, w = x_nchw.shape
    cin_w, cout, k_h, k_w = weight.shape
    assert groups == 1, "TODO(synk): groups != 1 not supported"
    assert cin == cin_w
    s_h, s_w = stride
    p_h, p_w = padding
    op_h, op_w = output_padding
    d_h, d_w = dilation
    assert op_h < max(s_h, d_h) and op_w < max(s_w, d_w), \
        "output_padding must be smaller than either stride or dilation"

    h_out = (h - 1) * s_h - 2 * p_h + d_h * (k_h - 1) + op_h + 1
    w_out = (w - 1) * s_w - 2 * p_w + d_w * (k_w - 1) + op_w + 1

    out_dtype = x_nchw.dtype
    if compute_dtype is None:
        compute_dtype = jnp.bfloat16 if x_nchw.dtype == jnp.float32 else x_nchw.dtype
    comp_isz = np.dtype(compute_dtype).itemsize
    out_isz = np.dtype(out_dtype).itemsize

    # ---- conv-transpose -> stride-1 direct conv on a zero-inserted, padded input.
    # One lax.pad: interior = stride-1 (zero insertion), edges lo/hi (negative
    # values crop, matching conv_transpose semantics for padding > d*(k-1)).
    lo_h = d_h * (k_h - 1) - p_h
    hi_h = lo_h + op_h
    lo_w = d_w * (k_w - 1) - p_w
    hi_w = lo_w + op_w
    xz = lax.pad(x_nchw.astype(compute_dtype), jnp.zeros((), compute_dtype),
                 [(0, 0, 0), (0, 0, 0),
                  (lo_h, hi_h, s_h - 1), (lo_w, hi_w, s_w - 1)])
    h_pad, w_pad = xz.shape[2], xz.shape[3]
    assert h_pad == h_out + d_h * (k_h - 1)
    assert w_pad == w_out + d_w * (k_w - 1)

    # ---- kw-shifted copies (kw-axis of the im2col only), cropped to the w_out
    # valid columns and flattened row-major with pitch w_out.  Every (kh, kw) tap
    # window over a run of output rows is then a contiguous slice of `flat`.
    shifted = jnp.stack(
        [xz[:, :, :, kw * d_w: kw * d_w + w_out] for kw in range(k_w)], axis=1)
    flat = shifted.reshape(n, k_w * cin, h_pad * w_out)   # (N, kW*Cin, H_pad*Wo)

    # ---- row-tile / VMEM planning.
    k_dim = k_h * k_w * cin
    try:
        vmem_cap = int(pltpu.get_tpu_info().vmem_capacity_bytes)
    except Exception:
        vmem_cap = 64 * 1024 * 1024        # conservative (v7x physical VMEM)
    budget = max(int(vmem_cap * 0.4), 4 * 1024 * 1024)
    th, vmem_need = _pick_row_tile(h_out, w_out, n, k_h, k_w, cin, cout, d_h,
                                   comp_isz, out_isz, budget)
    r_tiles = h_out // th
    tm = th * w_out
    halo = d_h * (k_h - 1) * w_out
    slab_len = tm + halo

    # Overlapping row slabs (halo = (kH-1)*d_h rows, a few % duplication) so the
    # kernel needs only static slices and input blocks never overlap.
    slabs = jnp.stack(
        [flat[:, :, r * tm: r * tm + slab_len] for r in range(r_tiles)], axis=1)
    # slabs: (N, R, kW*Cin, slab_len)

    # ---- weights: (Cin,Cout,kH,kW) --flip kH,kW--> (kH,kW,Cin,Cout)
    #               --> (K, Cout) --> (Cout, K), matching the patches' K ordering.
    w_flip = jnp.transpose(jnp.flip(weight, axis=(2, 3)), (2, 3, 0, 1))
    w_mat = w_flip.reshape(k_dim, cout).T.astype(compute_dtype)

    if bias is None:
        bias = jnp.zeros((cout,), jnp.float32)
    b2 = bias.reshape(cout, 1).astype(jnp.float32)

    kern = functools.partial(_convt_kernel, k_h=k_h, d_h=d_h, w_out=w_out, tm=tm)

    flops = int(2 * n * cout * k_dim * h_out * w_out)
    bytes_acc = int(slabs.size * comp_isz + w_mat.size * comp_isz + b2.size * 4
                    + n * cout * h_out * w_out * out_isz)
    vmem_limit = int(min(vmem_cap * 3 // 4,
                         max(32 * 1024 * 1024, vmem_need + 8 * 1024 * 1024)))

    out3 = pl.pallas_call(
        kern,
        out_shape=jax.ShapeDtypeStruct((n, cout, h_out * w_out), out_dtype),
        grid_spec=pltpu.PrefetchScalarGridSpec(
            num_scalar_prefetch=0,
            grid=(n, r_tiles),
            in_specs=[
                # per-(n, row-tile) slab; weights & bias stay VMEM-resident.
                pl.BlockSpec((1, 1, k_w * cin, slab_len),
                             lambda ni, ri: (ni, ri, 0, 0)),
                pl.BlockSpec((cout, k_dim), lambda ni, ri: (0, 0)),
                pl.BlockSpec((cout, 1), lambda ni, ri: (0, 0)),
            ],
            out_specs=pl.BlockSpec((1, cout, tm), lambda ni, ri: (ni, 0, ri)),
        ),
        compiler_params=pltpu.CompilerParams(
            dimension_semantics=("parallel", "parallel"),
            vmem_limit_bytes=vmem_limit,
            # Let XLA fuse the shifted-copy producer into the slab operand DMA.
            allow_input_fusion=[True, False, False],
        ),
        cost_estimate=pl.CostEstimate(flops=flops, transcendentals=0,
                                      bytes_accessed=bytes_acc),
    )(slabs, w_mat, b2)

    # Already in PyTorch channel order: only a free reshape, no transpose pass.
    return out3.reshape(n, cout, h_out, w_out)


def _ref_conv_transpose2d(x, weight, bias, stride, padding, output_padding,
                          dilation):
    """Pure-JAX reference (lax.conv_general_dilated) for correctness check."""
    k_h, k_w = weight.shape[2], weight.shape[3]
    d_h, d_w = dilation
    p_h, p_w = padding
    op_h, op_w = output_padding
    rhs = jnp.transpose(jnp.flip(weight, axis=(2, 3)), (1, 0, 2, 3))  # OIHW
    pads = [(d_h * (k_h - 1) - p_h, d_h * (k_h - 1) - p_h + op_h),
            (d_w * (k_w - 1) - p_w, d_w * (k_w - 1) - p_w + op_w)]
    out = lax.conv_general_dilated(
        x, rhs, window_strides=(1, 1), padding=pads,
        lhs_dilation=stride, rhs_dilation=dilation,
        dimension_numbers=("NCHW", "OIHW", "NCHW"))
    return out + bias.reshape(1, -1, 1, 1)


if __name__ == "__main__":
    # MetaConvTranspose2d(4, 8, kernel_size=4, stride=2, padding=1, bias=True)
    N, Cin, H, W = 2, 4, 16, 16
    Cout, kH, kW = 8, 4, 4
    stride, padding, output_padding, dilation = (2, 2), (1, 1), (0, 0), (1, 1)

    key = jax.random.PRNGKey(0)
    k1, k2, k3 = jax.random.split(key, 3)
    bound = 1.0 / math.sqrt(Cout * kH * kW)
    weight = jax.random.uniform(k1, (Cin, Cout, kH, kW), jnp.float32,
                                -bound, bound)
    bias = jax.random.uniform(k2, (Cout,), jnp.float32, -bound, bound)
    x = jax.random.normal(k3, (N, Cin, H, W), jnp.float32)

    ref = _ref_conv_transpose2d(x, weight, bias, stride, padding,
                                output_padding, dilation)

    # Default path: bf16 MXU operands, f32 accumulation (loose tolerance).
    out = meta_conv_transpose2d(x, weight, bias, stride=stride, padding=padding,
                                output_padding=output_padding,
                                dilation=dilation)
    out = jax.block_until_ready(out)
    assert out.shape == ref.shape == (N, Cout, 32, 32), out.shape
    if not jnp.allclose(out, ref, atol=2e-2, rtol=2e-2):
        raise AssertionError("Pallas conv_transpose2d (bf16 default) mismatch")

    # Explicit f32 operand path (tight tolerance).
    out_f32 = meta_conv_transpose2d(x, weight, bias, stride=stride,
                                    padding=padding,
                                    output_padding=output_padding,
                                    dilation=dilation,
                                    compute_dtype=jnp.float32)
    out_f32 = jax.block_until_ready(out_f32)
    if not jnp.allclose(out_f32, ref, atol=1e-4, rtol=1e-4):
        raise AssertionError("Pallas conv_transpose2d (f32) mismatch vs reference")

    # Second configuration: exercises output_padding and the full-sample-tile
    # fallback (h_out*w_out not a multiple of 128).
    stride2, padding2, outpad2 = (2, 2), (0, 0), (1, 1)
    ref2 = _ref_conv_transpose2d(x, weight, bias, stride2, padding2, outpad2,
                                 dilation)
    out2 = meta_conv_transpose2d(x, weight, bias, stride=stride2,
                                 padding=padding2, output_padding=outpad2,
                                 dilation=dilation, compute_dtype=jnp.float32)
    out2 = jax.block_until_ready(out2)
    assert out2.shape == ref2.shape == (N, Cout, 35, 35), out2.shape
    if not jnp.allclose(out2, ref2, atol=1e-4, rtol=1e-4):
        raise AssertionError("Pallas conv_transpose2d (config 2) mismatch")

    print("KERNEL_OK")
</pallas_src>

<mosaic_0001>
module attributes {stable_mosaic.version = 11 : i64} {
  func.func @_convt_kernel(%arg0: i32, %arg1: i32, %arg2: memref<1x1x16x352xbf16, #tpu.memory_space<vmem>>, %arg3: memref<8x64xbf16, #tpu.memory_space<vmem>>, %arg4: memref<8x1xf32, #tpu.memory_space<vmem>>, %arg5: memref<1x8x256xf32, #tpu.memory_space<vmem>>) attributes {dimension_semantics = [#tpu.dimension_semantics<parallel>, #tpu.dimension_semantics<parallel>], iteration_bounds = array<i64: 2, 4>, scalar_prefetch = 0 : i64, scratch_operands = 0 : i64, tpu.core_type = #tpu.core_type<tc>, window_params = [{transform_indices = @transform_0, window_bounds = array<i64: 1, 1, 16, 352>}, {pipeline_mode = #tpu.pipeline_mode<synchronous>, transform_indices = @transform_1, window_bounds = array<i64: 8, 64>}, {pipeline_mode = #tpu.pipeline_mode<synchronous>, transform_indices = @transform_2, window_bounds = array<i64: 8, 1>}, {transform_indices = @transform_3, window_bounds = array<i64: 1, 8, 256>}]} {
    %c0 = arith.constant 0 : index
    %c0_0 = arith.constant 0 : index
    %c0_1 = arith.constant 0 : index
    %c0_2 = arith.constant 0 : index
    %0 = vector.load %arg2[%c0, %c0_0, %c0_1, %c0_2] : memref<1x1x16x352xbf16, #tpu.memory_space<vmem>>, vector<1x1x16x352xbf16>
    %1 = vector.shape_cast %0 : vector<1x1x16x352xbf16> to vector<16x352xbf16>
    %2 = vector.extract_strided_slice %1 {offsets = [0, 0], sizes = [16, 256], strides = [1, 1]} : vector<16x352xbf16> to vector<16x256xbf16>
    %3 = vector.extract_strided_slice %1 {offsets = [0, 32], sizes = [16, 256], strides = [1, 1]} : vector<16x352xbf16> to vector<16x256xbf16>
    %4 = vector.extract_strided_slice %1 {offsets = [0, 64], sizes = [16, 256], strides = [1, 1]} : vector<16x352xbf16> to vector<16x256xbf16>
    %5 = vector.extract_strided_slice %1 {offsets = [0, 96], sizes = [16, 256], strides = [1, 1]} : vector<16x352xbf16> to vector<16x256xbf16>
    %6 = tpu.concatenate %2, %3, %4, %5 in 0 : vector<16x256xbf16>, vector<16x256xbf16>, vector<16x256xbf16>, vector<16x256xbf16> -> vector<64x256xbf16>
    %c0_3 = arith.constant 0 : index
    %c0_4 = arith.constant 0 : index
    %7 = vector.load %arg3[%c0_3, %c0_4] : memref<8x64xbf16, #tpu.memory_space<vmem>>, vector<8x64xbf16>
    %cst = arith.constant dense<0.000000e+00> : vector<8x256xf32>
    %8 = tpu.matmul %7, %6, %cst {dimension_numbers = #tpu.dot_dimension_numbers<[1], [0], [0], [1], [0, 0, 1, 1], [], []>} : vector<8x64xbf16>, vector<64x256xbf16>, vector<8x256xf32> -> vector<8x256xf32>
    %c0_5 = arith.constant 0 : index
    %c0_6 = arith.constant 0 : index
    %9 = vector.load %arg4[%c0_5, %c0_6] : memref<8x1xf32, #tpu.memory_space<vmem>>, vector<8x1xf32>
    %10 = vector.broadcast %9 : vector<8x1xf32> to vector<8x256xf32>
    %11 = arith.addf %8, %10 : vector<8x256xf32>
    %c0_7 = arith.constant 0 : index
    %c0_8 = arith.constant 0 : index
    %c0_9 = arith.constant 0 : index
    %12 = vector.load %arg5[%c0_7, %c0_8, %c0_9] : memref<1x8x256xf32, #tpu.memory_space<vmem>>, vector<1x8x256xf32>
    %13 = vector.shape_cast %12 : vector<1x8x256xf32> to vector<8x256xf32>
    %14 = vector.shape_cast %11 : vector<8x256xf32> to vector<1x8x256xf32>
    tpu.vector_store %arg5[%c0_7, %c0_8, %c0_9], %14 {strides = array<i32>} : memref<1x8x256xf32, #tpu.memory_space<vmem>>, vector<1x8x256xf32>,
    return
  }
  func.func @transform_0(%arg0: i32, %arg1: i32) -> (i32, i32, i32, i32) {
    %c0_i32 = arith.constant 0 : i32
    %c0_i32_0 = arith.constant 0 : i32
    %c0_i32_1 = arith.constant 0 : i32
    return %arg0, %arg1, %c0_i32, %c0_i32_0 : i32, i32, i32, i32
  }
  func.func @transform_1(%arg0: i32, %arg1: i32) -> (i32, i32) {
    %c0_i32 = arith.constant 0 : i32
    %c0_i32_0 = arith.constant 0 : i32
    %c0_i32_1 = arith.constant 0 : i32
    return %c0_i32, %c0_i32_0 : i32, i32
  }
  func.func @transform_2(%arg0: i32, %arg1: i32) -> (i32, i32) {
    %c0_i32 = arith.constant 0 : i32
    %c0_i32_0 = arith.constant 0 : i32
    %c0_i32_1 = arith.constant 0 : i32
    return %c0_i32, %c0_i32_0 : i32, i32
  }
  func.func @transform_3(%arg0: i32, %arg1: i32) -> (i32, i32, i32) {
    %c0_i32 = arith.constant 0 : i32
    %c0_i32_0 = arith.constant 0 : i32
    return %arg0, %c0_i32, %arg1 : i32, i32, i32
  }
}

</mosaic_0001>

<bundles_post_ra>
// kernel: tpu_custom_call.1
= control target key start
LH: loop header
LB: loop body
LE: loop exit
PB: predicated region body
PF: predicated region fallthrough
CT: control target
= control target key end

     0   :  { %8 = vsyncpa [#allocation3], 0  ;;  %s858_s0 = inlined_call_operand.hbm [shape: bf16[2,4,16,352], index: 0, kind: input, shape index: {}]   ;;  %s859_s1 = inlined_call_operand.vmem [shape: bf16[8,64], index: 1, kind: input, shape index: {}]   ;;  %s860_s2 = inlined_call_operand.vmem [shape: f32[8,1], index: 2, kind: input, shape index: {}]   ;;  %s861_s3 = inlined_call_operand.hbm [shape: f32[2,8,1024], index: 3, kind: output, shape index: {}]  }
   0x1   :  { %10 = vsyncpa [#allocation3 + $0x1], 0 }
   0x2   :  { %11 = vsyncpa [#allocation4], 0 }
   0x3   :  { %13 = vsyncpa [#allocation4 + $0x1], 0  ;;  %s684_s12 = smov 0   ;;  %s686_s13 = smov 0  }
   0x4   :  { %s688_s14 = smov 0   ;;  %s690_s15 = smov 0  }
   0x5   :  { %s692_s16 = smov 0   ;;  %s694_s17 = smov 0  }
   0x6   :  { %s696_s18 = smov 0   ;;  %s698_s19 = smov 0  }
   0x7 LB: > { %866 = sst [smem:[#allocation8_spill]] %s646_s17  ;;  %s419_s20 = sadd.s32 4294967295, %s654_s19   ;;  %s654_s19 = sphi %s698_s19, %s19_s19   ;;  %s650_s18 = sphi %s696_s18, %s878_s18   ;;  %s646_s17 = sphi %s694_s17, %s877_s17   ;;  %s642_s16 = sphi %s692_s16, %s876_s16   ;;  %s638_s15 = sphi %s690_s15, %s875_s15   ;;  %s634_s14 = sphi %s688_s14, %s881_s14   ;;  %s630_s13 = sphi %s686_s13, %s880_s13   ;;  %s626_s12 = sphi %s684_s12, %s879_s12  }
   0x8   : > { %867 = sst [smem:[#allocation9_spill]] %s650_s18  ;;  %s420_s21 = sadd.s32 4294967294, %s654_s19  }
   0x9   : > { %s28_s22 = sadd.s32 1, %s646_s17  ;;  %s31_s23 = sadd.s32 1, %s650_s18 }
   0xa   : > { %p29_p0 = scmp.ge.s32.totalorder %s28_s22, 4  ;;  %s40_s24 = sadd.s32 1, %s634_s14 }
   0xb   : > { %p47_p1 = scmp.ne.s32.totalorder %s634_s14, %s630_s13  ;;  %p48_p2 = scmp.eq.s32.totalorder %s654_s19, 0 }
   0xc   : > { %s883_s22 = smov (%p29_p0, %s28_s22), 0  ;;  %s885_s23 = smov (!%p29_p0, %s31_s23), %s650_s18 }
   0xd   : > { %868 = sst [smem:[#allocation10_spill]] %s883_s22  ;;  %s36_s25 = ssub.s32 %s646_s17, %s883_s22 }
   0xe   : > { %p737_p3 = por %p48_p2, %p47_p1  ;;  %p33_p4 = scmp.ge.s32.totalorder %s885_s23, 2 }
   0xf   : > { %p53_p5 = scmp.ne.s32.totalorder %s630_s13, %s626_s12  ;;  %p54_p6 = scmp.eq.s32.totalorder %s419_s20, 0 }
  0x10   : > { %p121_p7 = scmp.eq.s32.totalorder %s419_s20, 7  ;;  %s887_s23 = smov (%p33_p4, %s885_s23), 0 }
  0x11   : > { %870 = sst [smem:[#allocation11_spill]] %s887_s23  ;;  %p745_p8 = por %p54_p6, %p53_p5 }
  0x12   : > { %p749_p9 = por %p121_p7, %p47_p1  ;;  %s35_s29 = ssub.s32 %s650_s18, %s887_s23 }
  0x13   : > { %p127_p10 = scmp.eq.s32.totalorder %s420_s21, 7  ;;  %s37_s30 = sor.u32 %s36_s25, %s35_s29 }
  0x14   : > { %p38_p11 = scmp.eq.s32.totalorder %s37_s30, 0  ;;  %p452_p13 = scmp.lt.s32.totalorder %s654_s19, 8 }
  0x15   : > { %p755_p12 = por %p127_p10, %p53_p5  ;;  %s153_s5 = sand.u32 1, %s634_s14  }
  0x16   : > { %s762_s6 = scalar_select %p38_p11, %s634_s14, %s40_s24  }
  0x17   : > { %s436_s7 = smul.u32 24, %s153_s5  ;;  %p767_p0 = pnand %p452_p13, %p737_p3 }
  0x18   : > { %s437_s8 = smul.u32 6, %s646_s17  ;;  %s154_s24 = scalar_lea.sflag [#allocation3], %s153_s5 }
  0x19   : > { %s438_s10 = smul.u32 24, %s650_s18  ;;  %s157_s11 = scalar_lea.vmem [#allocation2], %s436_s7 }
  0x1a   : > { %s166_s20 = sshll.u32 %s157_s11, 4  ;;  %p532_p1 = pneg %p767_p0  ;;  %s167_s20 = int_to_ptr.vmem [resolvable:$true] %s166_s20 }
  0x1b   : > { %s163_s21 = sadd.s32 %s438_s10, %s437_s8  ;;  %s543_s22 = scalar_lea.vmem %s167_s20, 384 }
  0x1c   : > { %s423_s25 = sshll.u32 %s163_s21, 6  ;;  %p544_p2 = scmp.ne.s32.totalorder %s167_s20, %s543_s22 }
  0x1d   : > { %s165_s23 = scalar_lea.hbm %s858_s0, %s423_s25  ;;  %s656_s26 = smov [#allocation2]  }
  0x1e   : > { %p546_p3 = pnand %p544_p2, %p532_p1  ;;  %s548_s17 = sshll.u32 %s656_s26, 4  ;;  %s549_s17 = int_to_ptr.vmem [resolvable:$false] %s548_s17 }
  0x1f   : > { %s550_s18 = scalar_lea.vmem %s549_s17, 768  ;;  %p551_p5 = scmp.lt.s32.totalorder %s167_s20, %s549_s17 }
  0x20   : > { %p547_p4 = pneg %p546_p3  ;;  %p552_p6 = scmp.lt.s32.totalorder %s550_s18, %s543_s22 }
  0x22   : > { %p553_p7 = por %p552_p6, %p551_p5 }
  0x24   : > { %p554_p10 = pnand %p553_p7, %p547_p4 }
  0x26   : > { %557 = shalt.err (!%p554_p10)
}
  0x27   : > { %s657_s7 = smov 192   ;;  %s658_s5 = smov 12  }
  0x28   : > { %447 = dma.hbm_to_vmem [thread:$0]  (!%p767_p0), %s165_s23, 384, %s167_s20, %s154_s24, %s657_s7, %s657_s7, %s658_s5  }
  0x29   : > { %p424_p11 = scmp.ge.s32.totalorder %s654_s19, 1  ;;  %p174_p13 = scmp.lt.s32.totalorder %s654_s19, 9 }
  0x2b   : > { %p175_p1 = pnand %p424_p11, %p174_p13 }
  0x2c   : > { %s782_s8 = sand.u32 (!%p175_p1), 1, %s630_s13  }
  0x2d   : > { %178 = sbr.rel (%p175_p1) target bundleno = 402 (0x192), region = 32  ;;  %s181_s18 = scalar_lea.sflag (!%p175_p1), [#allocation3], %s782_s8 }
  0x2e   : > { %s439_s17 = smul.u32 (!%p175_p1), 24, %s782_s8 }
  0x30   : > { %s184_s22 = scalar_lea.vmem (!%p175_p1), [#allocation2], %s439_s17 }
  0x32   : > { %617 = dma.done.wait (%p745_p8), %s181_s18, 384  }
  0x33   : > { %619 = vsyncadd (%p745_p8), %s181_s18, 4294966912  ;;  %v526_v0 = vld [vmem:[%s184_s22 + $0x4] ss:$12 sps:$4 sm:$0xff]   ;;  %v528_v1 = vld [vmem:[%s184_s22] ss:$12 sps:$4 sm:$0xff]   ;;  %s659_s23 = smov 32  }
  0x34   : > { %252 = vrot.lane.b32.xlu0 %v526_v0, %s659_s23  ;;  %v529_v2 = vld [vmem:[%s184_s22 + $0x8] ss:$12 sps:$4 sm:$0xff]   ;;  %250 = vrot.lane.b32.xlu1 %v528_v1, %s659_s23  ;;  %s660_s9 = smov 64   ;;  %v661_v3 = vmov 0   ;;  %s662_s10 = smov 96   ;;  %vm256_vm0 = vcmask 261120  }
  0x35   : > { %304 = vmatprep.mubr.bf16.mxu0 %v661_v3  ;;  %524 = vset.pattern.permute.xlu1 %v661_v3  ;;  %v262_v4 = vld [vmem:[%s860_s2] sm:$0xff]  ;;  %vm245_vm1 = vcmask 523264   ;;  %vm234_vm2 = vcmask 785408   ;;  %s425_s25 = sshll.u32 %s782_s8, 4  ;;  %s431_s29 = sshll.u32 %s638_s15, 1 }
  0x36   : > { %525 = vset.pattern.permute.xlu0 %v661_v3  ;;  %v261_v20 = vld [vmem:[%s859_s1] sm:$0xf]  ;;  %s432_s30 = sshll.u32 %s642_s16, 3  ;;  %s206_s7 = scalar_lea.vmem [#allocation5], %s425_s25 }
  0x37   : > { %s328_s24 = sadd.s32 %s432_s30, %s431_s29  ;;  %s332_s5 = sshll.u32 %s206_s7, 4  ;;  %s807_s5 = int_to_ptr.vmem [resolvable:$true] %s332_s5 }
  0x38   : > { %254 = vrot.lane.b32.xlu0 %v529_v2, %s659_s23  ;;  %241 = vrot.lane.b32.xlu1 %v526_v0, %s660_s9  ;;  %s433_s26 = sshll.u32 %s328_s24, 7  ;;  %s316_s15 = scalar_lea.sflag [#allocation4], %s782_s8 }
  0x39   : > { %s805_s22 = scalar_lea.hbm %s861_s3, %s433_s26  ;;  %s558_s16 = scalar_lea.vmem %s807_s5, 256 }
  0x3a   : > { %p559_p8 = scmp.ne.s32.totalorder %s807_s5, %s558_s16  ;;  %s663_s23 = smov [#allocation5]  }
  0x3c   : > { %243 = vrot.lane.b32.xlu0 %v529_v2, %s660_s9  ;;  %239 = vrot.lane.b32.xlu1 %v528_v1, %s660_s9  ;;  %p560_p0 = pnand %p559_p8, %p749_p9  ;;  %s562_s9 = sshll.u32 %s663_s23, 4  ;;  %s563_s9 = int_to_ptr.vmem [resolvable:$false] %s562_s9 }
  0x3d   : > { %p565_p3 = scmp.lt.s32.totalorder %s807_s5, %s563_s9 }
  0x3e   : > { %p561_p2 = pneg %p560_p0 }
  0x40   : > { %230 = vrot.lane.b32.xlu0 %v526_v0, %s662_s10  ;;  %232 = vrot.lane.b32.xlu1 %v529_v2, %s662_s10 }
  0x44   : > { %228 = vrot.lane.b32.xlu0 %v528_v1, %s662_s10  ;;  %265 = vperm.xlu1 %524, %v262_v4   ;;  %s564_s10 = scalar_lea.vmem %s563_s9, 512 }
  0x45   : > { %p566_p4 = scmp.lt.s32.totalorder %s564_s10, %s558_s16 }
  0x47   : > { %p567_p5 = por %p566_p4, %p565_p3 }
  0x49   : > { %p568_p6 = pnand %p567_p5, %p561_p2 }
  0xa6   : > { %v253_v5 = vpop.permute.xlu0 %252  ;;  %v251_v6 = vpop.permute.xlu1 %250 }
  0xa7   : > { %v257_v10 = vsel %vm256_vm0, %v251_v6, %v253_v5 }
  0xaa   : > { %v255_v7 = vpop.permute.xlu0 %254  ;;  %v242_v8 = vpop.permute.xlu1 %241 }
  0xab   : > { %v258_v9 = vsel %vm256_vm0, %v253_v5, %v255_v7 }
  0xac   : > { %280 = vmatprep.subr.bf16.mxu0 %v258_v9 }
  0xad   : > { %281 = vmatpush1.bf16.msra.mxu0 %v257_v10 }
  0xae   : > { %v244_v11 = vpop.permute.xlu0 %243  ;;  %v240_v12 = vpop.permute.xlu1 %239 }
  0xaf   : > { %v247_v13 = vsel %vm245_vm1, %v242_v8, %v244_v11  ;;  %v246_v14 = vsel %vm245_vm1, %v240_v12, %v242_v8 }
  0xb0   : > { %282 = vmatprep.subr.bf16.mxu0 %v247_v13 }
  0xb1   : > { %283 = vmatpush1.bf16.msra.mxu0 %v246_v14 }
  0xb2   : > { %v231_v15 = vpop.permute.xlu0 %230  ;;  %v233_v16 = vpop.permute.xlu1 %232 }
  0xb3   : > { %v236_v17 = vsel %vm234_vm2, %v231_v15, %v233_v16 }
  0xb4   : > { %284 = vmatprep.subr.bf16.mxu0 %v236_v17 }
  0xb6   : > { %v229_v18 = vpop.permute.xlu0 %228 }
  0xb7   : > { %v235_v19 = vsel %vm234_vm2, %v229_v18, %v231_v15 }
  0xb8   : > { %285 = vmatpush1.bf16.msra.mxu0 %v235_v19 }
  0xb9   : > { %286 = vmatprep.subr.bf16.mxu0 %v526_v0 }
  0xbc   : > { %287 = vmatpush1.bf16.msra.mxu0 %v528_v1 }
  0xbf   : > { %429 = vmatmul.mubr.msk.bf16.vlgmr.msra.gmra.mxu0 %vm245_vm1, %v261_v20  ;;  %v266_v21 = vpop.permute.xlu1 %265 }
 0x17f   : > { %v306_v22 = vpop.f32.mrf.mxu0 }
 0x180   : > { %v307_v23 = vadd.f32 %v306_v22, %v266_v21 }
 0x181   : > { %v308_v24 = vpop.f32.mrf.mxu0 }
 0x182   : > { %313 = vst [vmem:[%s206_s7] sm:$0xff] %v307_v23  ;;  %v309_v25 = vadd.f32 %v308_v24, %v266_v21 }
 0x183   : > { %v310_v26 = vpop.f32.mrf.mxu0 }
 0x184   : > { %314 = vst [vmem:[%s206_s7 + $0x8] sm:$0xff] %v309_v25 }
 0x185   : > { %v311_v27 = vpop.f32.mrf.mxu0 }
 0x186   : > { %571 = shalt.err (!%p568_p6)
}
 0x187   : > { %s572_s27 = scalar_lea.hbm %s805_s22, 256  ;;  %s576_s20 = scalar_lea.hbm %s861_s3, 2048 }
 0x188   : > { %p573_p7 = scmp.ne.s32.totalorder %s805_s22, %s572_s27  ;;  %p577_p13 = scmp.lt.s32.totalorder %s805_s22, %s861_s3 }
 0x189   : > { %p578_p1 = scmp.lt.s32.totalorder %s576_s20, %s572_s27 }
 0x18a   : > { %p574_p10 = pnand %p573_p7, %p749_p9 }
 0x18b   : > { %p579_p8 = por %p578_p1, %p577_p13 }
 0x18c   : > { %p575_p11 = pneg %p574_p10 }
 0x18e   : > { %p580_p0 = pnand %p579_p8, %p575_p11 }
 0x190   : > { %583 = shalt.err (!%p580_p0)
}
 0x191   : > { %442 = dma.vmem_to_hbm [thread:$0]  (%p749_p9), %s807_s5, 256, %s805_s22, %s316_s15  }
 0x192 PF: > { %p453_p2 = scmp.ge.s32.totalorder %s654_s19, 2  ;;  %s344_s29 = sand.u32 1, %s626_s12  }
 0x193   : > { %s345_s30 = scalar_lea.sflag [#allocation4], %s344_s29 }
 0x194   : > { %p449_p3 = pnand %p453_p2, %p755_p12 }
 0x196   : > { %p450_p4 = pneg %p449_p3 }
 0x198   : > { %621 = dma.done.wait (%p450_p4), %s345_s30, 256  }
 0x199   : > { %623 = vsyncadd (%p450_p4), %s345_s30, 4294967040  ;;  %s19_s19 = sadd.s32 1, %s654_s19   ;;  %s875_s15 = sld [smem:[#allocation8_spill]] }
 0x19a   : > { %p16_p5 = scmp.ge.s32.totalorder %s19_s19, 10   ;;  %s876_s16 = sld [smem:[#allocation9_spill]] }
 0x19b   : > { %s877_s17 = sld [smem:[#allocation10_spill]]  ;;  %s879_s12 = smov %s630_s13 }
 0x19c   : > { %s878_s18 = sld [smem:[#allocation11_spill]]  ;;  %s880_s13 = smov %s634_s14 }
 0x19d   : > { %s881_s14 = smov %s762_s6  ;;  %18 = sbr.rel (!%p16_p5) target bundleno = 7 (0x7), region = 77 }
 0x1a2   :  { %350 = vsyncpa [#allocation3], 1 }
 0x1a3   :  { %352 = vsyncpa [#allocation3 + $0x1], 1 }
 0x1a4   :  { %353 = vsyncpa [#allocation4], 1 }
 0x1a5   :  { %355 = vsyncpa [#allocation4 + $0x1], 1 }

</bundles_post_ra>
